<compile_context>
chip_gen: v7x
topology: tpu7x:2x2x1
jax: 0.10.0
libtpu: 0.0.40
codegen_flags: <defaults>
</compile_context>

<pallas_src>
import functools
import math

import jax
import jax.numpy as jnp
from jax.experimental import pallas as pl
from jax.experimental.pallas import tpu as pltpu


# ---------------------------------------------------------------------------
# Pallas kernel: fused  (x @ W) + b  -> dropout -> + residual
# ---------------------------------------------------------------------------
def _dense_dropout_residual_kernel(seed_ref, x_ref, w_ref, b_ref, res_ref, out_ref,
                                   *, apply_dropout, keep_threshold, keep_scale):
    # bf16 MXU operands (streamed bf16 from HBM), fp32 accumulation.
    acc = jnp.dot(x_ref[...], w_ref[...], preferred_element_type=jnp.float32)
    acc = acc + b_ref[...]                                    # fp32 bias

    if apply_dropout:                                         # static python branch
        tm, tn = acc.shape
        j = pl.program_id(0)                                  # N tile (outer)
        i = pl.program_id(1)                                  # M tile (inner)
        # global element coordinates -> tiling-invariant mask
        rows = (jax.lax.broadcasted_iota(jnp.int32, (tm, tn), 0) + i * tm
                ).astype(jnp.uint32)
        cols = (jax.lax.broadcasted_iota(jnp.int32, (tm, tn), 1) + j * tn
                ).astype(jnp.uint32)
        seed = seed_ref[0].astype(jnp.uint32)
        # counter-based hash (murmur3-style finalizer) -> uniform u32/element
        h = (rows * jnp.uint32(0x9E3779B1)) ^ (cols * jnp.uint32(0x85EBCA77)) \
            ^ (seed * jnp.uint32(0xC2B2AE3D))
        h = h ^ (h >> 16)
        h = h * jnp.uint32(0x7FEB352D)
        h = h ^ (h >> 15)
        h = h * jnp.uint32(0x846CA68B)
        h = h ^ (h >> 16)
        # keep iff top-31 bits >= round(rate * 2^31)  (single shift + compare)
        keep = (h >> 1).astype(jnp.int32) >= keep_threshold
        acc = jnp.where(keep, acc * keep_scale, 0.0)

    out_ref[...] = (acc + res_ref[...].astype(jnp.float32)).astype(out_ref.dtype)


# ---------------------------------------------------------------------------
# Wrapper
# ---------------------------------------------------------------------------
def _round_up(x, m):
    return ((x + m - 1) // m) * m


def _cdiv(a, b):
    return -(-a // b)


def simvlm_output(hidden_states, residual, params, seed=0, *,
                  dropout_rate=0.0, train=False, block_m=256):
    """out = residual + dropout(hidden_states @ W + b)   (shapes (B, S, H))."""
    b, s, h = hidden_states.shape
    assert residual.shape == hidden_states.shape

    m = b * s
    out_dtype = jnp.promote_types(hidden_states.dtype, residual.dtype)

    # bf16 DMA/MXU streams for activation + weight; residual stays native dtype.
    x = hidden_states.reshape(m, h).astype(jnp.bfloat16)
    r = residual.reshape(m, h)
    w = params["w"].astype(jnp.bfloat16)            # stored bf16 -> no-op cast
    bias = params["b"].astype(jnp.float32).reshape(1, h)
    seed_arr = jnp.reshape(jnp.asarray(seed, jnp.int32), (1,))

    # --- tile selection ----------------------------------------------------
    tm = min(block_m, _round_up(m, 8))
    if m >= 16 and _cdiv(m, tm) < 2:        # >= 2 parallel M tiles (v7x megacore)
        tm = _round_up(_cdiv(m, 2), 8)
    # N tile: per-tile weight slab <= ~8 MiB (fits v5e/v6e/v7x even when
    # double-buffered); no N tiling when H is small or not 128-aligned.
    if h % 128 != 0 or h * h * 2 <= (8 << 20):
        tn = h
    else:
        tn = max((t for t in (1024, 512, 256, 128)
                  if h % t == 0 and h * t * 2 <= (8 << 20)), default=128)
    grid_m = _cdiv(m, tm)
    grid_n = _cdiv(h, tn)

    # --- dropout config (static) --------------------------------------------
    apply_dropout = bool(train) and float(dropout_rate) > 0.0
    kernel = functools.partial(
        _dense_dropout_residual_kernel,
        apply_dropout=apply_dropout,
        keep_threshold=int(round(float(dropout_rate) * (1 << 31))),
        keep_scale=(1.0 / (1.0 - float(dropout_rate))) if apply_dropout else 1.0,
    )

    # --- VMEM budget / cost hint --------------------------------------------
    r_bytes = r.dtype.itemsize
    o_bytes = jnp.dtype(out_dtype).itemsize
    vmem_bytes = 2 * (tm * h * 2            # x tile (bf16, double-buffered)
                      + h * tn * 2          # W slab (bf16)
                      + tn * 4              # bias
                      + tm * tn * r_bytes   # residual tile
                      + tm * tn * o_bytes)  # output tile
    vmem_limit = int(min(64 << 20, max(32 << 20, vmem_bytes * 3 // 2)))

    cost = pl.CostEstimate(
        flops=2 * m * h * h,
        transcendentals=0,
        bytes_accessed=m * h * 2 + h * h * 2 + h * 4 + m * h * r_bytes + m * h * o_bytes,
    )

    out = pl.pallas_call(
        kernel,
        grid_spec=pltpu.PrefetchScalarGridSpec(
            num_scalar_prefetch=1,                       # dropout seed in SMEM
            grid=(grid_n, grid_m),                       # N outer: W read once
            in_specs=[
                pl.BlockSpec((tm, h), lambda j, i, seed: (i, 0)),    # x row tile
                pl.BlockSpec((h, tn), lambda j, i, seed: (0, j)),    # W N-slab
                pl.BlockSpec((1, tn), lambda j, i, seed: (0, j)),    # bias slab
                pl.BlockSpec((tm, tn), lambda j, i, seed: (i, j)),   # residual tile
            ],
            out_specs=pl.BlockSpec((tm, tn), lambda j, i, seed: (i, j)),
        ),
        out_shape=jax.ShapeDtypeStruct((m, h), out_dtype),
        compiler_params=pltpu.CompilerParams(
            dimension_semantics=("parallel", "parallel"),
            vmem_limit_bytes=vmem_limit,
        ),
        cost_estimate=cost,
    )(seed_arr, x, w, bias, r)

    return out.reshape(b, s, h)


# ---------------------------------------------------------------------------
# Parameter init (deterministic, synthetic)
# ---------------------------------------------------------------------------
def init_params(key, hidden):
    k_w, k_b = jax.random.split(key)
    # nn.Linear(hidden, hidden): y = x @ W.T + b ; store W.T directly as (in, out),
    # pre-cast to bf16 so the forward pass does no per-call weight cast/pad glue.
    w = jax.random.normal(k_w, (hidden, hidden), jnp.float32) / math.sqrt(hidden)
    bias = 0.01 * jax.random.normal(k_b, (hidden,), jnp.float32)
    return {"w": w.astype(jnp.bfloat16), "b": bias}


# ---------------------------------------------------------------------------
# Self-test
# ---------------------------------------------------------------------------
if __name__ == "__main__":
    batch, seq_len, hidden = 2, 8, 32
    dropout_prob = 0.1

    key = jax.random.PRNGKey(0)
    k_h, k_r, k_p = jax.random.split(key, 3)
    hidden_states = jax.random.normal(k_h, (batch, seq_len, hidden), jnp.float32)
    residual = jax.random.normal(k_r, (batch, seq_len, hidden), jnp.float32)
    params = init_params(k_p, hidden)

    # --- eval mode (dropout == identity): deterministic, checked vs pure-JAX ref
    fwd_eval = jax.jit(functools.partial(simvlm_output,
                                         dropout_rate=dropout_prob, train=False))
    out = fwd_eval(hidden_states, residual, params)
    jax.block_until_ready(out)

    assert out.shape == (batch, seq_len, hidden), out.shape
    assert out.dtype == jnp.float32, out.dtype
    assert bool(jnp.all(jnp.isfinite(out)))

    hs_bf = hidden_states.astype(jnp.bfloat16).astype(jnp.float32)
    w_f32 = params["w"].astype(jnp.float32)
    ref = residual + (hs_bf @ w_f32 + params["b"])
    assert bool(jnp.allclose(out, ref, atol=2e-3, rtol=2e-3)), \
        float(jnp.max(jnp.abs(out - ref)))

    # --- train mode: dropout mask from the in-kernel counter-based hash
    fwd_train = jax.jit(functools.partial(simvlm_output,
                                          dropout_rate=dropout_prob, train=True))
    out_t = fwd_train(hidden_states, residual, params, 123)
    jax.block_until_ready(out_t)
    assert out_t.shape == (batch, seq_len, hidden)
    assert bool(jnp.all(jnp.isfinite(out_t)))
    # dropped elements produce out == residual exactly; fraction ~ dropout_prob
    dropped_frac = float(jnp.mean((out_t == residual).astype(jnp.float32)))
    assert 0.01 <= dropped_frac <= 0.3, dropped_frac

    print("KERNEL_OK")
</pallas_src>

<mosaic_0001>
module attributes {stable_mosaic.version = 11 : i64} {
  func.func @_dense_dropout_residual_kernel(%arg0: i32, %arg1: i32, %arg2: memref<1xi32, #tpu.memory_space<smem>>, %arg3: memref<8x32xbf16, #tpu.memory_space<vmem>>, %arg4: memref<32x32xbf16, #tpu.memory_space<vmem>>, %arg5: memref<1x32xf32, #tpu.memory_space<vmem>>, %arg6: memref<8x32xf32, #tpu.memory_space<vmem>>, %arg7: memref<8x32xf32, #tpu.memory_space<vmem>>) attributes {dimension_semantics = [#tpu.dimension_semantics<parallel>, #tpu.dimension_semantics<parallel>], iteration_bounds = array<i64: 1, 2>, scalar_prefetch = 1 : i64, scratch_operands = 0 : i64, tpu.core_type = #tpu.core_type<tc>, window_params = [{transform_indices = @transform_0, window_bounds = array<i64: 8, 32>}, {transform_indices = @transform_1, window_bounds = array<i64: 32, 32>}, {transform_indices = @transform_2, window_bounds = array<i64: 1, 32>}, {transform_indices = @transform_3, window_bounds = array<i64: 8, 32>}, {transform_indices = @transform_4, window_bounds = array<i64: 8, 32>}]} {
    %c0 = arith.constant 0 : index
    %c0_0 = arith.constant 0 : index
    %0 = vector.load %arg3[%c0, %c0_0] : memref<8x32xbf16, #tpu.memory_space<vmem>>, vector<8x32xbf16>
    %c0_1 = arith.constant 0 : index
    %c0_2 = arith.constant 0 : index
    %1 = vector.load %arg4[%c0_1, %c0_2] : memref<32x32xbf16, #tpu.memory_space<vmem>>, vector<32x32xbf16>
    %cst = arith.constant dense<0.000000e+00> : vector<8x32xf32>
    %2 = tpu.matmul %0, %1, %cst {dimension_numbers = #tpu.dot_dimension_numbers<[1], [0], [0], [1], [0, 0, 1, 1], [], []>} : vector<8x32xbf16>, vector<32x32xbf16>, vector<8x32xf32> -> vector<8x32xf32>
    %c0_3 = arith.constant 0 : index
    %c0_4 = arith.constant 0 : index
    %3 = vector.load %arg5[%c0_3, %c0_4] : memref<1x32xf32, #tpu.memory_space<vmem>>, vector<1x32xf32>
    %4 = vector.broadcast %3 : vector<1x32xf32> to vector<8x32xf32>
    %5 = arith.addf %2, %4 : vector<8x32xf32>
    %c0_5 = arith.constant 0 : index
    %c0_6 = arith.constant 0 : index
    %6 = vector.load %arg6[%c0_5, %c0_6] : memref<8x32xf32, #tpu.memory_space<vmem>>, vector<8x32xf32>
    %7 = arith.addf %5, %6 : vector<8x32xf32>
    %c0_7 = arith.constant 0 : index
    %c0_8 = arith.constant 0 : index
    %8 = vector.load %arg7[%c0_7, %c0_8] : memref<8x32xf32, #tpu.memory_space<vmem>>, vector<8x32xf32>
    tpu.vector_store %arg7[%c0_7, %c0_8], %7 {strides = array<i32>} : memref<8x32xf32, #tpu.memory_space<vmem>>, vector<8x32xf32>,
    return
  }
  func.func @transform_0(%arg0: i32, %arg1: i32, %arg2: memref<1xi32, #tpu.memory_space<smem>>) -> (i32, i32) {
    %c0_i32 = arith.constant 0 : i32
    %c0_i32_0 = arith.constant 0 : i32
    return %arg1, %c0_i32 : i32, i32
  }
  func.func @transform_1(%arg0: i32, %arg1: i32, %arg2: memref<1xi32, #tpu.memory_space<smem>>) -> (i32, i32) {
    %c0_i32 = arith.constant 0 : i32
    %c0_i32_0 = arith.constant 0 : i32
    return %c0_i32, %arg0 : i32, i32
  }
  func.func @transform_2(%arg0: i32, %arg1: i32, %arg2: memref<1xi32, #tpu.memory_space<smem>>) -> (i32, i32) {
    %c0_i32 = arith.constant 0 : i32
    %c0_i32_0 = arith.constant 0 : i32
    return %c0_i32, %arg0 : i32, i32
  }
  func.func @transform_3(%arg0: i32, %arg1: i32, %arg2: memref<1xi32, #tpu.memory_space<smem>>) -> (i32, i32) {
    %c0_i32 = arith.constant 0 : i32
    return %arg1, %arg0 : i32, i32
  }
  func.func @transform_4(%arg0: i32, %arg1: i32, %arg2: memref<1xi32, #tpu.memory_space<smem>>) -> (i32, i32) {
    %c0_i32 = arith.constant 0 : i32
    return %arg1, %arg0 : i32, i32
  }
}

</mosaic_0001>

<bundles_post_ra>
// kernel: simvlm_output.1
= control target key start
LH: loop header
LB: loop body
LE: loop exit
PB: predicated region body
PF: predicated region fallthrough
CT: control target
= control target key end

     0   :  { %11 = vsyncpa [#allocation5], 0  ;;  %s792_s0 = inlined_call_operand.<no memory space> [shape: s32[1], index: 0, kind: input, shape index: {}]   ;;  %s793_s1 = inlined_call_operand.vmem [shape: bf16[16,32], index: 1, kind: input, shape index: {}]   ;;  %s794_s2 = inlined_call_operand.vmem [shape: bf16[32,32], index: 2, kind: input, shape index: {}]   ;;  %s795_s3 = inlined_call_operand.vmem [shape: f32[1,32], index: 3, kind: input, shape index: {}]   ;;  %s796_s4 = inlined_call_operand.vmem [shape: f32[16,32], index: 4, kind: input, shape index: {}]   ;;  %s797_s5 = inlined_call_operand.hbm [shape: f32[16,32], index: 5, kind: output, shape index: {}]  }
   0x1   :  { %13 = vsyncpa [#allocation5 + $0x1], 0  ;;  %s666_s18 = smov 0   ;;  %s668_s0 = smov 0  }
   0x2   :  { %s670_s19 = smov 0   ;;  %s672_s20 = smov 0  }
   0x3   :  { %s674_s21 = smov 0   ;;  %s676_s22 = smov 0  }
   0x4 LB: > { %s465_s23 = sadd.s32 4294967295, %s631_s22   ;;  %s466_s24 = sadd.s32 4294967294, %s631_s22   ;;  %s631_s22 = sphi %s676_s22, %s19_s22   ;;  %s627_s21 = sphi %s674_s21, %s804_s21   ;;  %s623_s20 = sphi %s672_s20, %s803_s20   ;;  %s619_s19 = sphi %s670_s19, %s802_s19   ;;  %s615_s0 = sphi %s668_s0, %s801_s0   ;;  %s611_s18 = sphi %s666_s18, %s800_s18  }
   0x5   : > { %s28_s25 = sadd.s32 1, %s627_s21  ;;  %s146_s26 = sadd.s32 1, %s619_s19 }
   0x6   : > { %p29_p0 = scmp.ge.s32.totalorder %s28_s25, 2  ;;  %p156_p1 = scmp.ne.s32.totalorder %s619_s19, %s615_s0 }
   0x7   : > { %p157_p2 = scmp.eq.s32.totalorder %s465_s23, 1  ;;  %p162_p3 = scmp.ne.s32.totalorder %s615_s0, %s611_s18 }
   0x8   : > { %s806_s25 = smov (%p29_p0, %s28_s25), 0  ;;  %p163_p5 = scmp.eq.s32.totalorder %s466_s24, 1 }
   0x9   : > { %p706_p4 = por %p157_p2, %p156_p1  ;;  %s141_s28 = ssub.s32 %s627_s21, %s806_s25 }
   0xa   : > { %p471_p6 = scmp.ge.s32.totalorder %s631_s22, 1  ;;  %p144_p7 = scmp.eq.s32.totalorder %s141_s28, 0 }
   0xb   : > { %p713_p8 = por %p163_p5, %p162_p3  ;;  %p211_p9 = scmp.lt.s32.totalorder %s631_s22, 3 }
   0xc   : > { %s719_s30 = scalar_select %p144_p7, %s619_s19, %s146_s26  }
   0xd   : > { %p212_p10 = pnand %p471_p6, %p211_p9 }
   0xe   : > { %v551_v0 = vld [vmem:[%s794_s2] sm:$0xff] (!%p212_p10)   ;;  %v633_v1 = vmov (!%p212_p10), 0.0   ;;  %v552_v2 = vld [vmem:[%s794_s2 + $0x8] sm:$0xff] (!%p212_p10)   ;;  %vm634_vm0 = vmmov (!%p212_p10), 0   ;;  %p250_p11 = scmp.lt.s32.totalorder (!%p212_p10), %s623_s20, 1  ;;  %vm293_vm1 = vcmask (!%p212_p10), 261120  }
   0xf   : > { %215 = sbr.rel (%p212_p10) target bundleno = 257 (0x101), region = 36  ;;  %486 = vmatprep.subr.bf16.mxu0 (!%p212_p10), %v633_v1  ;;  %490 = vmatprep.mubr.msk.bf16.mxu0 (!%p212_p10), %vm634_vm0, %v633_v1  ;;  %s247_s15 = sand.u32 (!%p212_p10), 1, %s615_s0   ;;  %v475_v4 = vld [vmem:[%s795_s3] ss:$0 sm:$0xff] (!%p212_p10) }
  0x10   : > { %487 = vmatpush3.bf16.msra.mxu0 (!%p212_p10), %v551_v0  ;;  %s472_s17 = sshll.u32 (!%p212_p10), %s247_s15, 3  ;;  %s480_s7 = sshll.u32 (!%p212_p10), %s623_s20, 7 }
  0x11   : > { %488 = vmatprep.subr.bf16.mxu0 (!%p212_p10), %v633_v1  ;;  %s249_s8 = scalar_lea.vmem (!%p212_p10), [#allocation4], %s472_s17  ;;  %s744_s12 = scalar_lea.hbm (!%p212_p10), %s797_s5, %s480_s7 }
  0x12   : > { %s355_s9 = sshll.u32 (!%p212_p10), %s249_s8, 4  ;;  %s746_s9 = int_to_ptr.vmem [resolvable:$true] %s355_s9 }
  0x13   : > { %s553_s13 = scalar_lea.vmem (!%p212_p10), %s746_s9, 128 }
  0x14   : > { %489 = vmatpush3.bf16.msra.mxu0 (!%p212_p10), %v552_v2  ;;  %p554_p12 = scmp.ne.s32.totalorder (!%p212_p10), %s746_s9, %s553_s13 }
  0x16   : > { %s251_s10 = scalar_select %p250_p11, %s623_s20, 1 }
  0x17   : > { %s341_s20 = scalar_lea.sflag [#allocation5], %s247_s15  ;;  %p555_p13 = pnand %p554_p12, %p706_p4 }
  0x18   : > { %s473_s11 = sshll.u32 %s251_s10, 2  ;;  %s474_s16 = sshll.u32 %s251_s10, 3 }
  0x19   : > { %s253_s14 = scalar_lea.vmem %s793_s1, %s473_s11  ;;  %s267_s26 = scalar_lea.vmem %s796_s4, %s474_s16 }
  0x1a   : > { %v269_v3 = vld [vmem:[%s253_s14] sm:$0xf]  ;;  %p556_p0 = pneg %p555_p13  ;;  %s635_s14 = smov [#allocation4]  }
  0x1b   : > { %491 = vmatmul.mubr.msk.bf16.vlgmr.msra.gmra.mrb[0].mxu0 %vm293_vm1, %v269_v3  ;;  %v337_v6 = vld [vmem:[%s267_s26] sm:$0xff]  ;;  %s557_s16 = sshll.u32 %s635_s14, 4  ;;  %s558_s16 = int_to_ptr.vmem [resolvable:$false] %s557_s16 }
  0x1c   : > { %s559_s17 = scalar_lea.vmem %s558_s16, 256  ;;  %p560_p1 = scmp.lt.s32.totalorder %s746_s9, %s558_s16 }
  0x1d   : > { %p561_p2 = scmp.lt.s32.totalorder %s559_s17, %s553_s13 }
  0x1f   : > { %p562_p3 = por %p561_p2, %p560_p1 }
  0x21   : > { %p563_p5 = pnand %p562_p3, %p556_p0 }
  0xee   : > { %v331_v5 = vpop.f32.mrb[0].mxu0 }
  0xef   : > { %v332_v7 = vadd.f32 %v475_v4, %v331_v5  ;;  %v492_v8 = vpop.f32.mrb[1].mxu0 }
  0xf0   : > { %v334_v9 = vpop.f32.mrb[2].mxu0 }
  0xf1   : > { %v338_v10 = vadd.f32 %v337_v6, %v332_v7  ;;  %v493_v11 = vpop.f32.mrb[3].mxu0 }
  0xf3   : > { %339 = vst.msk [vmem:[%s249_s8] sm:$0xff] %vm293_vm1, %v338_v10 }
  0xf4   : > { %566 = shalt.err (!%p563_p5)
}
  0xf5   : > { %s567_s15 = scalar_lea.hbm %s744_s12, 128  ;;  %s571_s26 = scalar_lea.hbm %s797_s5, 256 }
  0xf6   : > { %p568_p6 = scmp.ne.s32.totalorder %s744_s12, %s567_s15  ;;  %p572_p10 = scmp.lt.u32.totalorder %s744_s12, %s797_s5 }
  0xf7   : > { %p573_p11 = scmp.lt.u32.totalorder %s571_s26, %s567_s15  ;;  %p575_p13 = scmp.lt.u32.totalorder %s567_s15, %s744_s12 }
  0xf8   : > { %p569_p7 = pnand %p568_p6, %p706_p4 }
  0xf9   : > { %p574_p12 = por %p573_p11, %p572_p10 }
  0xfa   : > { %p570_p9 = pneg %p569_p7 }
  0xfb   : > { %p576_p0 = por %p575_p13, %p574_p12 }
  0xfd   : > { %p577_p1 = pnand %p576_p0, %p570_p9 }
  0xff   : > { %580 = shalt.err (!%p577_p1)
}
 0x100   : > { %494 = dma.vmem_to_hbm [thread:$0]  (%p706_p4), %s746_s9, 128, %s744_s12, %s341_s20  }
 0x101 PF: > { %p500_p2 = scmp.ge.s32.totalorder %s631_s22, 2  ;;  %s367_s7 = sand.u32 1, %s611_s18  }
 0x102   : > { %s368_s8 = scalar_lea.sflag [#allocation5], %s367_s7 }
 0x103   : > { %p497_p3 = pnand %p500_p2, %p713_p8 }
 0x105   : > { %606 = dma.done.wait (!%p497_p3), %s368_s8, 128  }
 0x106   : > { %608 = vsyncadd (!%p497_p3), %s368_s8, 4294967168  ;;  %s19_s22 = sadd.s32 1, %s631_s22   ;;  %s800_s18 = smov %s615_s0 }
 0x107   : > { %p16_p5 = scmp.ge.s32.totalorder %s19_s22, 4   ;;  %s801_s0 = smov %s619_s19 }
 0x108   : > { %s802_s19 = smov %s719_s30  ;;  %s803_s20 = smov %s627_s21 }
 0x109   : > { %s804_s21 = smov %s806_s25  ;;  %18 = sbr.rel (!%p16_p5) target bundleno = 4 (0x4), region = 80 }
 0x110   :  { %373 = vsyncpa [#allocation5], 1 }
 0x111   :  { %375 = vsyncpa [#allocation5 + $0x1], 1 }

</bundles_post_ra>
